<compile_context>
chip_gen: v6e
topology: v6e:2x2x1
jax: 0.10.0
libtpu: 0.0.40
codegen_flags: <defaults>
</compile_context>

<pallas_src>
import jax
import jax.numpy as jnp
from jax.experimental import pallas as pl
from jax.experimental.pallas import tpu as pltpu


def _mlp_kernel(x_ref,
                w1_ref, b1_ref,
                w2_ref, b2_ref,
                w3_ref, b3_ref,
                w4_ref, b4_ref,
                o_ref):
    # (tb, input_dim) f32 batch-major tile -> feature-major (input_dim, tb) bf16.
    # Transpose rides the XLU; cast rides the VPU; both hide under MXU time.
    xt = x_ref[...].T.astype(jnp.bfloat16)                       # (input_dim, tb)

    h = jnp.dot(w1_ref[...], xt,
                preferred_element_type=jnp.float32) + b1_ref[...]          # (hidden, tb) f32
    h = jnp.maximum(h, 0.0)
    h = jnp.dot(w2_ref[...], h.astype(jnp.bfloat16),
                preferred_element_type=jnp.float32) + b2_ref[...]
    h = jnp.maximum(h, 0.0)
    h = jnp.dot(w3_ref[...], h.astype(jnp.bfloat16),
                preferred_element_type=jnp.float32) + b3_ref[...]
    h = jnp.maximum(h, 0.0)

    # hidden -> 1: VPU multiply + sublane (XLU) reduction; avoids a 1-wide MXU pass.
    y = jnp.sum(h * w4_ref[...], axis=0, keepdims=True) + b4_ref[0, 0]     # (1, tb) lane-dense
    o_ref[...] = y.astype(o_ref.dtype)


def physics_nn_forward(x, params, *, tb=2048):
    """Fused PhysicsNN.forward. x: (B, input_dim) f32 -> (B, 1) f32."""
    (w1, b1), (w2, b2), (w3, b3), (w4, b4) = params
    B, input_dim = x.shape

    # --- batch-tile selection -------------------------------------------------------------
    tb = max(128, (int(tb) // 128) * 128)
    tb = min(tb, 2048)                               # v5e default scoped-VMEM headroom
    b128 = pl.cdiv(B, 128) * 128
    if b128 >= 256:
        # Guarantee >= 2 grid steps so v7x's 2 TensorCores both get a share of the batch.
        tb = min(tb, max(128, ((b128 // 2) // 128) * 128))
    else:
        tb = 128
    nsteps = pl.cdiv(B, tb)
    bp = nsteps * tb                                 # padded output width (lane-dense blocks)

    # One-time tiny casts; bf16 weights stay VMEM-resident across all grid steps.
    w1b = w1.astype(jnp.bfloat16)
    w2b = w2.astype(jnp.bfloat16)
    w3b = w3.astype(jnp.bfloat16)

    # Constant block index => block stays resident in VMEM across grid steps (no re-DMA).
    def resident(a):
        return pl.BlockSpec(a.shape, lambda i: (0, 0))

    out = pl.pallas_call(
        _mlp_kernel,
        out_shape=jax.ShapeDtypeStruct((1, bp), jnp.float32),
        grid=(nsteps,),
        in_specs=[
            # x tile, batch-major; last grid step may over-read past B (garbage rows stay in
            # their own lanes and are discarded by the output slice below).
            pl.BlockSpec((tb, input_dim), lambda i: (i, 0)),
            resident(w1b), resident(b1),
            resident(w2b), resident(b2),
            resident(w3b), resident(b3),
            resident(w4),
            pl.BlockSpec(memory_space=pltpu.MemorySpace.SMEM),   # b4 scalar in SMEM
        ],
        out_specs=pl.BlockSpec((1, tb), lambda i: (0, i)),       # lane-dense output row
        compiler_params=pltpu.CompilerParams(
            dimension_semantics=("parallel",),
            vmem_limit_bytes=32 * 1024 * 1024,
        ),
    )(x, w1b, b1, w2b, b2, w3b, b3, w4, b4)

    return out[0, :B].reshape(B, 1)


def init_params(key, input_dim, hidden_dim):
    """PyTorch nn.Linear-style init: U[-1/sqrt(fan_in), +1/sqrt(fan_in)] for W and b.

    Layout used by the kernel's feature-major formulation:
      w1: (hidden, input_dim)  b1: (hidden, 1)
      w2: (hidden, hidden)     b2: (hidden, 1)
      w3: (hidden, hidden)     b3: (hidden, 1)
      w4: (hidden, 1)  (final weight stored as a column)        b4: (1, 1)
    """
    dims = [(input_dim, hidden_dim),
            (hidden_dim, hidden_dim),
            (hidden_dim, hidden_dim),
            (hidden_dim, 1)]
    params = []
    for i, (fan_in, fan_out) in enumerate(dims):
        kw, kb = jax.random.split(jax.random.fold_in(key, i))
        bound = float(fan_in) ** -0.5
        w = jax.random.uniform(kw, (fan_out, fan_in), jnp.float32, -bound, bound)
        b = jax.random.uniform(kb, (fan_out, 1), jnp.float32, -bound, bound)
        params.append((w, b))
    w4, b4 = params[3]
    params[3] = (w4.T, b4)        # w4 as (hidden, 1) column; b4 (1, 1)
    return params


def _reference_forward_f32(x, params):
    (w1, b1), (w2, b2), (w3, b3), (w4, b4) = params
    h = jnp.maximum(x @ w1.T + b1.T, 0.0)
    h = jnp.maximum(h @ w2.T + b2.T, 0.0)
    h = jnp.maximum(h @ w3.T + b3.T, 0.0)
    return h @ w4 + b4


def _reference_forward_bf16(x, params):
    """Mirrors the kernel's bf16-operand / f32-accumulate math for a tight check."""
    (w1, b1), (w2, b2), (w3, b3), (w4, b4) = params
    bf = jnp.bfloat16
    h = jnp.dot(x.astype(bf), w1.astype(bf).T, preferred_element_type=jnp.float32) + b1.T
    h = jnp.maximum(h, 0.0)
    h = jnp.dot(h.astype(bf), w2.astype(bf).T, preferred_element_type=jnp.float32) + b2.T
    h = jnp.maximum(h, 0.0)
    h = jnp.dot(h.astype(bf), w3.astype(bf).T, preferred_element_type=jnp.float32) + b3.T
    h = jnp.maximum(h, 0.0)
    return jnp.dot(h, w4, preferred_element_type=jnp.float32) + b4


if __name__ == "__main__":
    key = jax.random.PRNGKey(0)
    # hidden_dim matches the module default (128); batch deliberately NOT a multiple of 128
    # to exercise the over-read tail path, and >= 256 so the tb clamp yields a 2-step grid.
    batch, input_dim, hidden_dim = 250, 16, 128

    k_x, k_p = jax.random.split(key)
    x = jax.random.normal(k_x, (batch, input_dim), jnp.float32)
    params = init_params(k_p, input_dim, hidden_dim)

    fwd = jax.jit(physics_nn_forward)
    out = jax.block_until_ready(fwd(x, params))

    ref_f32 = _reference_forward_f32(x, params)
    ref_bf16 = _reference_forward_bf16(x, params)

    assert out.shape == (batch, 1), out.shape
    # Loose check vs the exact f32 module semantics (bf16 matmul operands, f32 accumulation).
    assert jnp.allclose(out, ref_f32, atol=5e-2, rtol=5e-2), \
        float(jnp.max(jnp.abs(out - ref_f32)))
    # Tight check vs a reference that mirrors the kernel's bf16/f32 mixed-precision math.
    assert jnp.allclose(out, ref_bf16, atol=2e-3, rtol=2e-3), \
        float(jnp.max(jnp.abs(out - ref_bf16)))

    # TODO(synk): physics_loss / check_predictions / uncertainty_estimate are host-side
    # training / diagnostic utilities (MC-dropout also needs dropout layers the module's
    # `net` does not contain); not part of the forward hot path, so not kernelized.
    print("KERNEL_OK")
</pallas_src>

<mosaic_0001>
module attributes {stable_mosaic.version = 11 : i64} {
  func.func @_mlp_kernel(%arg0: i32, %arg1: memref<128x16xf32, #tpu.memory_space<vmem>>, %arg2: memref<128x16xbf16, #tpu.memory_space<vmem>>, %arg3: memref<128x1xf32, #tpu.memory_space<vmem>>, %arg4: memref<128x128xbf16, #tpu.memory_space<vmem>>, %arg5: memref<128x1xf32, #tpu.memory_space<vmem>>, %arg6: memref<128x128xbf16, #tpu.memory_space<vmem>>, %arg7: memref<128x1xf32, #tpu.memory_space<vmem>>, %arg8: memref<128x1xf32, #tpu.memory_space<vmem>>, %arg9: memref<1x1xf32, #tpu.memory_space<smem>>, %arg10: memref<1x128xf32, #tpu.memory_space<vmem>>) attributes {dimension_semantics = [#tpu.dimension_semantics<parallel>], iteration_bounds = array<i64: 2>, scalar_prefetch = 0 : i64, scratch_operands = 0 : i64, tpu.core_type = #tpu.core_type<tc>, window_params = [{transform_indices = @transform_0, window_bounds = array<i64: 128, 16>}, {pipeline_mode = #tpu.pipeline_mode<synchronous>, transform_indices = @transform_1, window_bounds = array<i64: 128, 16>}, {pipeline_mode = #tpu.pipeline_mode<synchronous>, transform_indices = @transform_2, window_bounds = array<i64: 128, 1>}, {pipeline_mode = #tpu.pipeline_mode<synchronous>, transform_indices = @transform_3, window_bounds = array<i64: 128, 128>}, {pipeline_mode = #tpu.pipeline_mode<synchronous>, transform_indices = @transform_4, window_bounds = array<i64: 128, 1>}, {pipeline_mode = #tpu.pipeline_mode<synchronous>, transform_indices = @transform_5, window_bounds = array<i64: 128, 128>}, {pipeline_mode = #tpu.pipeline_mode<synchronous>, transform_indices = @transform_6, window_bounds = array<i64: 128, 1>}, {pipeline_mode = #tpu.pipeline_mode<synchronous>, transform_indices = @transform_7, window_bounds = array<i64: 128, 1>}, {transform_indices = @transform_8, window_bounds = array<i64: 1, 1>}, {transform_indices = @transform_9, window_bounds = array<i64: 1, 128>}]} {
    %c0 = arith.constant 0 : index
    %c0_0 = arith.constant 0 : index
    %0 = vector.load %arg1[%c0, %c0_0] : memref<128x16xf32, #tpu.memory_space<vmem>>, vector<128x16xf32>
    %1 = tpu.transpose %0, [1, 0] : vector<128x16xf32> -> vector<16x128xf32>
    %2 = arith.truncf %1 : vector<16x128xf32> to vector<16x128xbf16>
    %c0_1 = arith.constant 0 : index
    %c0_2 = arith.constant 0 : index
    %3 = vector.load %arg2[%c0_1, %c0_2] : memref<128x16xbf16, #tpu.memory_space<vmem>>, vector<128x16xbf16>
    %cst = arith.constant dense<0.000000e+00> : vector<128x128xf32>
    %4 = tpu.matmul %3, %2, %cst {dimension_numbers = #tpu.dot_dimension_numbers<[1], [0], [0], [1], [0, 0, 1, 1], [], []>} : vector<128x16xbf16>, vector<16x128xbf16>, vector<128x128xf32> -> vector<128x128xf32>
    %c0_3 = arith.constant 0 : index
    %c0_4 = arith.constant 0 : index
    %5 = vector.load %arg3[%c0_3, %c0_4] : memref<128x1xf32, #tpu.memory_space<vmem>>, vector<128x1xf32>
    %6 = vector.broadcast %5 : vector<128x1xf32> to vector<128x128xf32>
    %7 = arith.addf %4, %6 : vector<128x128xf32>
    %cst_5 = arith.constant 0.000000e+00 : f32
    %8 = vector.broadcast %cst_5 : f32 to vector<128x128xf32>
    %9 = arith.maximumf %7, %8 : vector<128x128xf32>
    %c0_6 = arith.constant 0 : index
    %c0_7 = arith.constant 0 : index
    %10 = vector.load %arg4[%c0_6, %c0_7] : memref<128x128xbf16, #tpu.memory_space<vmem>>, vector<128x128xbf16>
    %11 = arith.truncf %9 : vector<128x128xf32> to vector<128x128xbf16>
    %cst_8 = arith.constant dense<0.000000e+00> : vector<128x128xf32>
    %12 = tpu.matmul %10, %11, %cst_8 {dimension_numbers = #tpu.dot_dimension_numbers<[1], [0], [0], [1], [0, 0, 1, 1], [], []>} : vector<128x128xbf16>, vector<128x128xbf16>, vector<128x128xf32> -> vector<128x128xf32>
    %c0_9 = arith.constant 0 : index
    %c0_10 = arith.constant 0 : index
    %13 = vector.load %arg5[%c0_9, %c0_10] : memref<128x1xf32, #tpu.memory_space<vmem>>, vector<128x1xf32>
    %14 = vector.broadcast %13 : vector<128x1xf32> to vector<128x128xf32>
    %15 = arith.addf %12, %14 : vector<128x128xf32>
    %cst_11 = arith.constant 0.000000e+00 : f32
    %16 = vector.broadcast %cst_11 : f32 to vector<128x128xf32>
    %17 = arith.maximumf %15, %16 : vector<128x128xf32>
    %c0_12 = arith.constant 0 : index
    %c0_13 = arith.constant 0 : index
    %18 = vector.load %arg6[%c0_12, %c0_13] : memref<128x128xbf16, #tpu.memory_space<vmem>>, vector<128x128xbf16>
    %19 = arith.truncf %17 : vector<128x128xf32> to vector<128x128xbf16>
    %cst_14 = arith.constant dense<0.000000e+00> : vector<128x128xf32>
    %20 = tpu.matmul %18, %19, %cst_14 {dimension_numbers = #tpu.dot_dimension_numbers<[1], [0], [0], [1], [0, 0, 1, 1], [], []>} : vector<128x128xbf16>, vector<128x128xbf16>, vector<128x128xf32> -> vector<128x128xf32>
    %c0_15 = arith.constant 0 : index
    %c0_16 = arith.constant 0 : index
    %21 = vector.load %arg7[%c0_15, %c0_16] : memref<128x1xf32, #tpu.memory_space<vmem>>, vector<128x1xf32>
    %22 = vector.broadcast %21 : vector<128x1xf32> to vector<128x128xf32>
    %23 = arith.addf %20, %22 : vector<128x128xf32>
    %cst_17 = arith.constant 0.000000e+00 : f32
    %24 = vector.broadcast %cst_17 : f32 to vector<128x128xf32>
    %25 = arith.maximumf %23, %24 : vector<128x128xf32>
    %c0_18 = arith.constant 0 : index
    %c0_19 = arith.constant 0 : index
    %26 = vector.load %arg8[%c0_18, %c0_19] : memref<128x1xf32, #tpu.memory_space<vmem>>, vector<128x1xf32>
    %27 = vector.broadcast %26 : vector<128x1xf32> to vector<128x128xf32>
    %28 = arith.mulf %25, %27 : vector<128x128xf32>
    %cst_20 = arith.constant dense<0.000000e+00> : vector<128xf32>
    %29 = vector.multi_reduction <add>, %28, %cst_20 [0] : vector<128x128xf32> to vector<128xf32>
    %30 = vector.shape_cast %29 : vector<128xf32> to vector<1x128xf32>
    %c0_21 = arith.constant 0 : index
    %c0_22 = arith.constant 0 : index
    %31 = memref.load %arg9[%c0_21, %c0_22] : memref<1x1xf32, #tpu.memory_space<smem>>
    %32 = vector.broadcast %31 : f32 to vector<1x128xf32>
    %33 = arith.addf %30, %32 : vector<1x128xf32>
    %c0_23 = arith.constant 0 : index
    %c0_24 = arith.constant 0 : index
    %34 = vector.load %arg10[%c0_23, %c0_24] : memref<1x128xf32, #tpu.memory_space<vmem>>, vector<1x128xf32>
    tpu.vector_store %arg10[%c0_23, %c0_24], %33 {strides = array<i32>} : memref<1x128xf32, #tpu.memory_space<vmem>>, vector<1x128xf32>,
    return
  }
  func.func @transform_0(%arg0: i32) -> (i32, i32) {
    %c0_i32 = arith.constant 0 : i32
    %c0_i32_0 = arith.constant 0 : i32
    return %arg0, %c0_i32 : i32, i32
  }
  func.func @transform_1(%arg0: i32) -> (i32, i32) {
    %c0_i32 = arith.constant 0 : i32
    %c0_i32_0 = arith.constant 0 : i32
    %c0_i32_1 = arith.constant 0 : i32
    return %c0_i32, %c0_i32_0 : i32, i32
  }
  func.func @transform_2(%arg0: i32) -> (i32, i32) {
    %c0_i32 = arith.constant 0 : i32
    %c0_i32_0 = arith.constant 0 : i32
    %c0_i32_1 = arith.constant 0 : i32
    return %c0_i32, %c0_i32_0 : i32, i32
  }
  func.func @transform_3(%arg0: i32) -> (i32, i32) {
    %c0_i32 = arith.constant 0 : i32
    %c0_i32_0 = arith.constant 0 : i32
    %c0_i32_1 = arith.constant 0 : i32
    return %c0_i32, %c0_i32_0 : i32, i32
  }
  func.func @transform_4(%arg0: i32) -> (i32, i32) {
    %c0_i32 = arith.constant 0 : i32
    %c0_i32_0 = arith.constant 0 : i32
    %c0_i32_1 = arith.constant 0 : i32
    return %c0_i32, %c0_i32_0 : i32, i32
  }
  func.func @transform_5(%arg0: i32) -> (i32, i32) {
    %c0_i32 = arith.constant 0 : i32
    %c0_i32_0 = arith.constant 0 : i32
    %c0_i32_1 = arith.constant 0 : i32
    return %c0_i32, %c0_i32_0 : i32, i32
  }
  func.func @transform_6(%arg0: i32) -> (i32, i32) {
    %c0_i32 = arith.constant 0 : i32
    %c0_i32_0 = arith.constant 0 : i32
    %c0_i32_1 = arith.constant 0 : i32
    return %c0_i32, %c0_i32_0 : i32, i32
  }
  func.func @transform_7(%arg0: i32) -> (i32, i32) {
    %c0_i32 = arith.constant 0 : i32
    %c0_i32_0 = arith.constant 0 : i32
    %c0_i32_1 = arith.constant 0 : i32
    return %c0_i32, %c0_i32_0 : i32, i32
  }
  func.func @transform_8(%arg0: i32) -> (i32, i32) {
    %c0_i32 = arith.constant 0 : i32
    %c0_i32_0 = arith.constant 0 : i32
    %c0_i32_1 = arith.constant 0 : i32
    return %c0_i32, %c0_i32_0 : i32, i32
  }
  func.func @transform_9(%arg0: i32) -> (i32, i32) {
    %c0_i32 = arith.constant 0 : i32
    %c0_i32_0 = arith.constant 0 : i32
    return %c0_i32, %arg0 : i32, i32
  }
}

</mosaic_0001>

<bundles_post_ra>
// kernel: physics_nn_forward.1
= control target key start
LH: loop header
LB: loop body
LE: loop exit
PB: predicated region body
PF: predicated region fallthrough
CT: control target
= control target key end

     0   :  { %s1679_s11 = smov 0   ;;  %s2014_s0 = inlined_call_operand.vmem [shape: f32[250,16], index: 0, kind: input, shape index: {}]   ;;  %s2015_s1 = inlined_call_operand.vmem [shape: bf16[128,16], index: 1, kind: input, shape index: {}]   ;;  %s2016_s2 = inlined_call_operand.vmem [shape: f32[128,1], index: 2, kind: input, shape index: {}]   ;;  %s2017_s3 = inlined_call_operand.vmem [shape: bf16[128,128], index: 3, kind: input, shape index: {}]   ;;  %s2018_s4 = inlined_call_operand.vmem [shape: f32[128,1], index: 4, kind: input, shape index: {}]   ;;  %s2019_s5 = inlined_call_operand.vmem [shape: bf16[128,128], index: 5, kind: input, shape index: {}]   ;;  %s2020_s6 = inlined_call_operand.vmem [shape: f32[128,1], index: 6, kind: input, shape index: {}]   ;;  %s2021_s7 = inlined_call_operand.vmem [shape: f32[128,1], index: 7, kind: input, shape index: {}]   ;;  %s2022_s8 = inlined_call_operand.<no memory space> [shape: f32[1,1], index: 8, kind: input, shape index: {}]   ;;  %s2023_s9 = inlined_call_operand.vmem [shape: f32[1,256], index: 9, kind: output, shape index: {}]  }
   0x1   :  { %14 = sst [smem:[#allocation2]] %s2022_s8 }
   0x2 LB: > { %s1685_s12 = sadd.s32 4294967295, %s1623_s11   ;;  %p1422_p0 = scmp.ge.s32.totalorder %s1623_s11, 1  ;;  %s1623_s11 = sphi %s1679_s11, %s20_s11  }
   0x3   : > { %p289_p1 = scmp.lt.s32.totalorder %s1623_s11, 3 }
   0x5   : > { %p290_p2 = pnand %p1422_p0, %p289_p1 }
   0x6   : > { %s1423_s13 = sshll.u32 (!%p290_p2), %s1685_s12, 4  ;;  %s1367_s8 = sld [smem:[#allocation2]] (!%p290_p2) }
   0x7   : > { %293 = sbr.rel (%p290_p2) target bundleno = 919 (0x397), region = 56  ;;  %p324_p3 = scmp.lt.s32.totalorder (!%p290_p2), %s1423_s13, 31 }
   0x8   : > { %p329_p4 = scmp.lt.s32.totalorder (!%p290_p2), %s1685_s12, 1 }
   0xc   : > { %v412_v0 = vld [vmem:[%s2016_s2 + $0x70] sm:$0xff]  ;;  %v1625_v1 = vmov 0   ;;  %s2025_s13 = smov (!%p324_p3, %s1423_s13), 31  ;;  %v413_v2 = vld [vmem:[%s2016_s2 + $0x78] sm:$0xff]  ;;  %v410_v4 = vld [vmem:[%s2016_s2 + $0x60] sm:$0xff]  ;;  %vm534_vm0 = vcmask 130048  }
   0xd   : > { %1591 = vset.pattern.permute.xlu1 %v1625_v1  ;;  %s1424_s17 = sshll.u32 %s2025_s13, 3  ;;  %v411_v6 = vld [vmem:[%s2016_s2 + $0x68] sm:$0xff]  ;;  %v408_v8 = vld [vmem:[%s2016_s2 + $0x50] sm:$0xff]  ;;  %v1593_v9 = vld [vmem:[%s2015_s1] sm:$0xff]   ;;  %s2027_s12 = smov (!%p329_p4, %s1685_s12), 1 }
   0xe   : > { %486 = vperm.xlu1 %1591, %v412_v0   ;;  %s1700_s20 = scalar_lea.vmem %s2014_s0, %s1424_s17  ;;  %1502 = vmatprep.mubr.msk.bf16.mxu0 %vm534_vm0, %v1593_v9  ;;  %v409_v11 = vld [vmem:[%s2016_s2 + $0x58] sm:$0xff]  ;;  %v406_v13 = vld [vmem:[%s2016_s2 + $0x40] sm:$0xff]  ;;  %v407_v15 = vld [vmem:[%s2016_s2 + $0x48] sm:$0xff]  ;;  %s331_s17 = scalar_lea.vmem %s2023_s9, %s2027_s12 }
   0xf   : > { %v333_v3 = vld [vmem:[%s1700_s20] sm:$0xff]  ;;  %v334_v5 = vld [vmem:[%s1700_s20 + $0x8] sm:$0xff]  ;;  %v335_v7 = vld [vmem:[%s1700_s20 + $0x10] sm:$0xff] }
  0x10   : > { %349 = vxpose.xlu0.b32.start [1/16] (narrow) %v333_v3, 16  ;;  %v336_v10 = vld [vmem:[%s1700_s20 + $0x18] sm:$0xff]  ;;  %v337_v12 = vld [vmem:[%s1700_s20 + $0x20] sm:$0xff]  ;;  %v338_v14 = vld [vmem:[%s1700_s20 + $0x28] sm:$0xff] }
  0x11   : > { %v339_v16 = vld [vmem:[%s1700_s20 + $0x30] sm:$0xff]  ;;  %v340_v18 = vld [vmem:[%s1700_s20 + $0x38] sm:$0xff]  ;;  %v341_v20 = vld [vmem:[%s1700_s20 + $0x40] sm:$0xff] }
  0x12   : > { %491 = vperm.xlu1 %1591, %v413_v2   ;;  %v404_v17 = vld [vmem:[%s2016_s2 + $0x30] sm:$0xff]  ;;  %v405_v19 = vld [vmem:[%s2016_s2 + $0x38] sm:$0xff]  ;;  %v402_v21 = vld [vmem:[%s2016_s2 + $0x20] sm:$0xff] }
  0x13   : > { %v342_v22 = vld [vmem:[%s1700_s20 + $0x48] sm:$0xff]  ;;  %v343_v24 = vld [vmem:[%s1700_s20 + $0x50] sm:$0xff]  ;;  %v344_v26 = vld [vmem:[%s1700_s20 + $0x58] sm:$0xff] }
  0x14   : > { %350 = vxpose.xlu0.b32.cont [2/16] (narrow) %v334_v5, 16  ;;  %v403_v23 = vld [vmem:[%s2016_s2 + $0x28] sm:$0xff]  ;;  %v400_v25 = vld [vmem:[%s2016_s2 + $0x10] sm:$0xff]  ;;  %v401_v27 = vld [vmem:[%s2016_s2 + $0x18] sm:$0xff] }
  0x15   : > { %v345_v28 = vld [vmem:[%s1700_s20 + $0x60] sm:$0xff]  ;;  %v346_v30 = vld [vmem:[%s1700_s20 + $0x68] sm:$0xff]  ;;  %v347_v32 = vld [vmem:[%s1700_s20 + $0x70] sm:$0xff] }
  0x16   : > { %476 = vperm.xlu1 %1591, %v410_v4   ;;  %v398_v29 = vld [vmem:[%s2016_s2] sm:$0xff]  ;;  %v399_v31 = vld [vmem:[%s2016_s2 + $0x8] sm:$0xff]  ;;  %v711_v33 = vld [vmem:[%s2018_s4 + $0x78] sm:$0xff] }
  0x17   : > { %v348_v34 = vld [vmem:[%s1700_s20 + $0x78] sm:$0xff]  ;;  %v708_v35 = vld [vmem:[%s2018_s4 + $0x60] sm:$0xff]  ;;  %v709_v36 = vld [vmem:[%s2018_s4 + $0x68] sm:$0xff] }
  0x18   : > { %351 = vxpose.xlu0.b32.cont [3/16] (narrow) %v335_v7, 16  ;;  %v706_v37 = vld [vmem:[%s2018_s4 + $0x50] sm:$0xff]  ;;  %v707_v38 = vld [vmem:[%s2018_s4 + $0x58] sm:$0xff]  ;;  %v704_v39 = vld [vmem:[%s2018_s4 + $0x40] sm:$0xff] }
  0x19   : > { %v705_v40 = vld [vmem:[%s2018_s4 + $0x48] sm:$0xff]  ;;  %v702_v41 = vld [vmem:[%s2018_s4 + $0x30] sm:$0xff]  ;;  %v703_v42 = vld [vmem:[%s2018_s4 + $0x38] sm:$0xff] }
  0x1a   : > { %481 = vperm.xlu1 %1591, %v411_v6   ;;  %v700_v43 = vld [vmem:[%s2018_s4 + $0x20] sm:$0xff]  ;;  %v701_v44 = vld [vmem:[%s2018_s4 + $0x28] sm:$0xff]  ;;  %v699_v45 = vld [vmem:[%s2018_s4 + $0x18] sm:$0xff] }
  0x1b   : > { %v697_v46 = vld [vmem:[%s2018_s4 + $0x8] sm:$0xff]  ;;  %v980_v48 = vld [vmem:[%s2020_s6 + $0x18] sm:$0xff]  ;;  %v1234_v49 = vld [vmem:[%s2021_s7] sm:$0xff] }
  0x1c   : > { %352 = vxpose.xlu0.b32.cont [4/16] (narrow) %v336_v10, 16  ;;  %v978_v47 = vld [vmem:[%s2020_s6 + $0x8] sm:$0xff]  ;;  %v1236_v50 = vld [vmem:[%s2021_s7 + $0x10] sm:$0xff]  ;;  %v1237_v51 = vld [vmem:[%s2021_s7 + $0x18] sm:$0xff] }
  0x1d   : > { %v1238_v53 = vld [vmem:[%s2021_s7 + $0x20] sm:$0xff]  ;;  %v1594_v56 = vld [vmem:[%s2015_s1 + $0x8] sm:$0xff]   ;;  %v1595_v58 = vld [vmem:[%s2015_s1 + $0x10] sm:$0xff]  }
  0x1e   : > { %466 = vperm.xlu1 %1591, %v408_v8   ;;  %v1239_v57 = vld [vmem:[%s2021_s7 + $0x28] sm:$0xff]  ;;  %v1240_v59 = vld [vmem:[%s2021_s7 + $0x30] sm:$0xff]  ;;  %v1596_v60 = vld [vmem:[%s2015_s1 + $0x18] sm:$0xff]  }
  0x1f   : > { %v1241_v61 = vld [vmem:[%s2021_s7 + $0x38] sm:$0xff]  ;;  %v1597_v62 = vld [vmem:[%s2015_s1 + $0x20] sm:$0xff]   ;;  %v1598_v0 = vld [vmem:[%s2015_s1 + $0x28] sm:$0xff]  }
  0x20   : > { %353 = vxpose.xlu0.b32.cont [5/16] (narrow) %v337_v12, 16  ;;  %v1242_v63 = vld [vmem:[%s2021_s7 + $0x40] sm:$0xff]  ;;  %v1599_v2 = vld [vmem:[%s2015_s1 + $0x30] sm:$0xff]   ;;  %v1600_v4 = vld [vmem:[%s2015_s1 + $0x38] sm:$0xff]  }
  0x21   : > { %v1244_v3 = vld [vmem:[%s2021_s7 + $0x50] sm:$0xff]  ;;  %v1245_v5 = vld [vmem:[%s2021_s7 + $0x58] sm:$0xff]  ;;  %v1246_v6 = vld [vmem:[%s2021_s7 + $0x60] sm:$0xff] }
  0x22   : > { %471 = vperm.xlu1 %1591, %v409_v11   ;;  %v1247_v7 = vld [vmem:[%s2021_s7 + $0x68] sm:$0xff]  ;;  %v1249_v8 = vld [vmem:[%s2021_s7 + $0x78] sm:$0xff]  ;;  %v1601_v9 = vld [vmem:[%s2017_s3] sm:$0xff]  }
  0x23   : > { %1534 = vmatprep.mubr.bf16.mxu1 %v1601_v9  ;;  %v710_v11 = vld [vmem:[%s2018_s4 + $0x70] sm:$0xff] }
  0x24   : > { %354 = vxpose.xlu0.b32.cont [6/16] (narrow) %v338_v14, 16  ;;  %v698_v12 = vld [vmem:[%s2018_s4 + $0x10] sm:$0xff]  ;;  %v696_v14 = vld [vmem:[%s2018_s4] sm:$0xff] }
  0x26   : > { %456 = vperm.xlu1 %1591, %v406_v13  }
  0x28   : > { %355 = vxpose.xlu0.b32.cont [7/16] (narrow) %v339_v16, 16  ;;  %v977_v16 = vld [vmem:[%s2020_s6] sm:$0xff] }
  0x2a   : > { %461 = vperm.xlu1 %1591, %v407_v15  }
  0x2c   : > { %356 = vxpose.xlu0.b32.cont [8/16] (narrow) %v340_v18, 16 }
  0x2e   : > { %446 = vperm.xlu1 %1591, %v404_v17   ;;  %v979_v17 = vld [vmem:[%s2020_s6 + $0x10] sm:$0xff] }
  0x30   : > { %357 = vxpose.xlu0.b32.cont [9/16] (narrow) %v341_v20, 16 }
  0x32   : > { %451 = vperm.xlu1 %1591, %v405_v19   ;;  %v981_v19 = vld [vmem:[%s2020_s6 + $0x20] sm:$0xff] }
  0x34   : > { %358 = vxpose.xlu0.b32.cont [10/16] (narrow) %v342_v22, 16  ;;  %v982_v22 = vld [vmem:[%s2020_s6 + $0x28] sm:$0xff] }
  0x36   : > { %436 = vperm.xlu1 %1591, %v402_v21   ;;  %v1235_v21 = vld [vmem:[%s2021_s7 + $0x8] sm:$0xff] }
  0x38   : > { %359 = vxpose.xlu0.b32.cont [11/16] (narrow) %v343_v24, 16  ;;  %v983_v24 = vld [vmem:[%s2020_s6 + $0x30] sm:$0xff] }
  0x3a   : > { %441 = vperm.xlu1 %1591, %v403_v23  }
  0x3c   : > { %360 = vxpose.xlu0.b32.cont [12/16] (narrow) %v344_v26, 16  ;;  %v984_v26 = vld [vmem:[%s2020_s6 + $0x38] sm:$0xff] }
  0x3e   : > { %426 = vperm.xlu1 %1591, %v400_v25  }
  0x40   : > { %361 = vxpose.xlu0.b32.cont [13/16] (narrow) %v345_v28, 16  ;;  %v985_v28 = vld [vmem:[%s2020_s6 + $0x40] sm:$0xff] }
  0x42   : > { %431 = vperm.xlu1 %1591, %v401_v27  }
  0x44   : > { %362 = vxpose.xlu0.b32.cont [14/16] (narrow) %v346_v30, 16 }
  0x46   : > { %416 = vperm.xlu1 %1591, %v398_v29  }
  0x48   : > { %363 = vxpose.xlu0.b32.cont [15/16] (narrow) %v347_v32, 16  ;;  %v986_v32 = vld [vmem:[%s2020_s6 + $0x48] sm:$0xff] }
  0x4a   : > { %421 = vperm.xlu1 %1591, %v399_v31  }
  0x4c   : > { %364 = vxpose.xlu0.b32.end [16/16] (narrow) %v348_v34, 16 }
  0x4e   : > { %789 = vperm.xlu1 %1591, %v711_v33  }
  0x52   : > { %774 = vperm.xlu1 %1591, %v708_v35  }
  0x56   : > { %779 = vperm.xlu1 %1591, %v709_v36   ;;  %v987_v36 = vld [vmem:[%s2020_s6 + $0x50] sm:$0xff] }
  0x5a   : > { %764 = vperm.xlu1 %1591, %v706_v37  }
  0x5e   : > { %769 = vperm.xlu1 %1591, %v707_v38  }
  0x62   : > { %754 = vperm.xlu1 %1591, %v704_v39   ;;  %v988_v39 = vld [vmem:[%s2020_s6 + $0x58] sm:$0xff] }
  0x66   : > { %759 = vperm.xlu1 %1591, %v705_v40  }
  0x6a   : > { %744 = vperm.xlu1 %1591, %v702_v41  }
  0x6e   : > { %749 = vperm.xlu1 %1591, %v703_v42  }
  0x72   : > { %734 = vperm.xlu1 %1591, %v700_v43   ;;  %v989_v43 = vld [vmem:[%s2020_s6 + $0x60] sm:$0xff] }
  0x75   : > { %1592 = vset.pattern.permute.xlu0 %v1625_v1  ;;  %v1243_v1 = vld [vmem:[%s2021_s7 + $0x48] sm:$0xff] }
  0x76   : > { %739 = vperm.xlu1 %1591, %v701_v44   ;;  %784 = vperm.xlu0 %1592, %v710_v11  }
  0x7a   : > { %729 = vperm.xlu1 %1591, %v699_v45   ;;  %724 = vperm.xlu0 %1592, %v698_v12  }
  0x7e   : > { %719 = vperm.xlu1 %1591, %v697_v46   ;;  %714 = vperm.xlu0 %1592, %v696_v14  }
  0x82   : > { %1000 = vperm.xlu1 %1591, %v978_v47   ;;  %995 = vperm.xlu0 %1592, %v977_v16   ;;  %v990_v47 = vld [vmem:[%s2020_s6 + $0x68] sm:$0xff] }
  0x86   : > { %1010 = vperm.xlu1 %1591, %v980_v48   ;;  %1005 = vperm.xlu0 %1592, %v979_v17  }
  0x89   : > { %v487_v10 = vpop.permute.xlu1 %486 }
  0x8a   : > { %1252 = vperm.xlu1 %1591, %v1234_v49   ;;  %1015 = vperm.xlu0 %1592, %v981_v19  }
  0x8c   : > { %v365_v52 = vpop.trf.xlu0 }
  0x8d   : > { %v492_v13 = vpop.permute.xlu1 %491 }
  0x8e   : > { %1262 = vperm.xlu1 %1591, %v1236_v50   ;;  %1257 = vperm.xlu0 %1592, %v1235_v21   ;;  %v991_v50 = vld [vmem:[%s2020_s6 + $0x70] sm:$0xff] }
  0x90   : > { %v366_v54 = vpop.trf.xlu0 }
  0x91   : > { %v381_v55 = vpack.c.bf16 %v366_v54, %v365_v52  ;;  %v477_v15 = vpop.permute.xlu1 %476 }
  0x92   : > { %1267 = vperm.xlu1 %1591, %v1237_v51   ;;  %1020 = vperm.xlu0 %1592, %v982_v22  }
  0x93   : > { %1500 = vmatprep.subr.bf16.mxu0 %v381_v55 }
  0x94   : > { %1501 = vmatpush3.bf16.msra.mxu0 %v381_v55 }
  0x95   : > { %v482_v18 = vpop.permute.xlu1 %481 }
  0x96   : > { %1272 = vperm.xlu1 %1591, %v1238_v53   ;;  %1025 = vperm.xlu0 %1592, %v983_v24  }
  0x97   : > { %1503 = vmatmul.mubr.msk.bf16.vlgmr.msra.gmra.mxu0 %vm534_vm0, %v1594_v56 }
  0x98   : > { %1506 = vmatprep.mubr.msk.bf16.mxu0 %vm534_vm0, %v1595_v58 }
  0x99   : > { %v467_v20 = vpop.permute.xlu1 %466 }
  0x9a   : > { %1277 = vperm.xlu1 %1591, %v1239_v57   ;;  %1030 = vperm.xlu0 %1592, %v984_v26   ;;  %v992_v57 = vld [vmem:[%s2020_s6 + $0x78] sm:$0xff] }
  0x9d   : > { %v472_v23 = vpop.permute.xlu1 %471 }
  0x9e   : > { %1282 = vperm.xlu1 %1591, %v1240_v59   ;;  %1035 = vperm.xlu0 %1592, %v985_v28  }
  0x9f   : > { %1507 = vmatmul.mubr.msk.bf16.gmra.mxu0 %vm534_vm0, %v1596_v60 }
  0xa0   : > { %1510 = vmatprep.mubr.msk.bf16.mxu0 %vm534_vm0, %v1597_v62 }
  0xa1   : > { %v457_v25 = vpop.permute.xlu1 %456 }
  0xa2   : > { %1287 = vperm.xlu1 %1591, %v1241_v61   ;;  %1040 = vperm.xlu0 %1592, %v986_v32  }
  0xa5   : > { %v462_v29 = vpop.permute.xlu1 %461 }
  0xa6   : > { %1292 = vperm.xlu1 %1591, %v1242_v63   ;;  %1045 = vperm.xlu0 %1592, %v987_v36  }
  0xa7   : > { %1511 = vmatmul.mubr.msk.bf16.gmra.mxu0 %vm534_vm0, %v1598_v0 }
  0xa8   : > { %1514 = vmatprep.mubr.msk.bf16.mxu0 %vm534_vm0, %v1599_v2 }
  0xa9   : > { %v447_v34 = vpop.permute.xlu1 %446 }
  0xaa   : > { %1297 = vperm.xlu1 %1591, %v1243_v1   ;;  %1050 = vperm.xlu0 %1592, %v988_v39  }
  0xad   : > { %v452_v40 = vpop.permute.xlu1 %451 }
  0xae   : > { %1302 = vperm.xlu1 %1591, %v1244_v3   ;;  %1055 = vperm.xlu0 %1592, %v989_v43   ;;  %v1608_v43 = vld [vmem:[%s2017_s3 + $0x38] sm:$0xff]  }
  0xaf   : > { %1515 = vmatmul.mubr.msk.bf16.gmra.mxu0 %vm534_vm0, %v1600_v4  ;;  %v1248_v4 = vld [vmem:[%s2021_s7 + $0x70] sm:$0xff] }
  0xb1   : > { %v437_v45 = vpop.permute.xlu1 %436 }
  0xb2   : > { %1307 = vperm.xlu1 %1591, %v1245_v5   ;;  %1060 = vperm.xlu0 %1592, %v990_v47  }
  0xb5   : > { %v442_v51 = vpop.permute.xlu1 %441 }
  0xb6   : > { %1312 = vperm.xlu1 %1591, %v1246_v6   ;;  %1065 = vperm.xlu0 %1592, %v991_v50  }
  0xb9   : > { %v427_v63 = vpop.permute.xlu1 %426 }
  0xba   : > { %1317 = vperm.xlu1 %1591, %v1247_v7   ;;  %1070 = vperm.xlu0 %1592, %v992_v57  }
  0xbe   : > { %1327 = vperm.xlu1 %1591, %v1249_v8   ;;  %1322 = vperm.xlu0 %1592, %v1248_v4  }
 0x157   : > { %v1913_v27 = vpop.f32.mrf.mxu0 }
 0x159   : > { %v1918_v30 = vpop.f32.mrf.mxu0 }
 0x15b   : > { %v1920_v31 = vpop.f32.mrf.mxu0 }
 0x15d   : > { %v1925_v33 = vpop.f32.mrf.mxu0 }
 0x15f   : > { %v1508_v35 = vpop.f32.mrf.mxu0 }
 0x160   : > { %v618_v14 = vadd.f32 %v1508_v35, %v447_v34 }
 0x161   : > { %v609_v37 = vpop.f32.mrf.mxu0 }
 0x162   : > { %v610_v21 = vadd.f32 %v609_v37, %v437_v45 }
 0x163   : > { %v1509_v38 = vpop.f32.mrf.mxu0 }
 0x164   : > { %v621_v11 = vadd.f32 %v1509_v38, %v452_v40  ;;  %v660_v26 = vmax.f32 %v610_v21, 0.0  ;;  %v1605_v40 = vld [vmem:[%s2017_s3 + $0x20] sm:$0xff]  }
 0x165   : > { %v612_v41 = vpop.f32.mrf.mxu0 }
 0x166   : > { %v663_v16 = vmax.f32 %v621_v11, 0.0  ;;  %v613_v17 = vadd.f32 %v612_v41, %v442_v51  ;;  %v1606_v41 = vld [vmem:[%s2017_s3 + $0x28] sm:$0xff]  }
 0x167   : > { %v1512_v42 = vpop.f32.mrf.mxu0 }
 0x168   : > { %v634_v0 = vadd.f32 %v1512_v42, %v467_v20  ;;  %v662_v20 = vmax.f32 %v618_v14, 0.0  ;;  %v661_v24 = vmax.f32 %v613_v17, 0.0  ;;  %v1607_v42 = vld [vmem:[%s2017_s3 + $0x30] sm:$0xff]  }
 0x169   : > { %v625_v44 = vpop.f32.mrf.mxu0 }
 0x16a   : > { %v666_v8 = vmax.f32 %v634_v0, 0.0  ;;  %v626_v9 = vadd.f32 %v625_v44, %v457_v25  ;;  %v602_v25 = vadd.f32 %v1913_v27, %v427_v63  ;;  %v690_v34 = vpack.c.bf16 %v661_v24, %v660_v26  ;;  %v1602_v27 = vld [vmem:[%s2017_s3 + $0x8] sm:$0xff]   ;;  %v1609_v44 = vld [vmem:[%s2019_s5] sm:$0xff]  }
 0x16b   : > { %v1513_v46 = vpop.f32.mrf.mxu0  ;;  %1566 = vmatprep.mubr.bf16.mxu0 %v1609_v44 }
 0x16c   : > { %v637_v59 = vadd.f32 %v1513_v46, %v472_v23  ;;  %v691_v23 = vpack.c.bf16 %v663_v16, %v662_v20  ;;  %v658_v35 = vmax.f32 %v602_v25, 0.0 }
 0x16d   : > { %v628_v48 = vpop.f32.mrf.mxu0 }
 0x16e   : > { %v667_v5 = vmax.f32 %v637_v59, 0.0  ;;  %v629_v6 = vadd.f32 %v628_v48, %v462_v29 }
 0x16f   : > { %v1516_v49 = vpop.f32.mrf.mxu0 }
 0x170   : > { %v650_v53 = vadd.f32 %v1516_v49, %v487_v10  ;;  %v432_v10 = vpop.permute.xlu1 %431  ;;  %v693_v12 = vpack.c.bf16 %v667_v5, %v666_v8 }
 0x171   : > { %v641_v52 = vpop.f32.mrf.mxu0  ;;  %v605_v22 = vadd.f32 %v1920_v31, %v432_v10 }
 0x172   : > { %v642_v55 = vadd.f32 %v641_v52, %v477_v15  ;;  %v670_v60 = vmax.f32 %v650_v53, 0.0  ;;  %v664_v15 = vmax.f32 %v626_v9, 0.0 }
 0x173   : > { %v1517_v54 = vpop.f32.mrf.mxu0  ;;  %v659_v29 = vmax.f32 %v605_v22, 0.0 }
 0x174   : > { %v653_v56 = vadd.f32 %v1517_v54, %v492_v13  ;;  %v668_v1 = vmax.f32 %v642_v55, 0.0  ;;  %v665_v13 = vmax.f32 %v629_v6, 0.0  ;;  %v417_v19 = vpop.permute.xlu1 %416 }
 0x175   : > { %v644_v58 = vpop.f32.mrf.mxu0  ;;  %v594_v36 = vadd.f32 %v1918_v30, %v417_v19  ;;  %v689_v37 = vpack.c.bf16 %v659_v29, %v658_v35  ;;  %v1604_v30 = vld [vmem:[%s2017_s3 + $0x18] sm:$0xff]  }
 0x176   : > { %v671_v61 = vmax.f32 %v653_v56, 0.0  ;;  %v645_v62 = vadd.f32 %v644_v58, %v482_v18  ;;  %v692_v18 = vpack.c.bf16 %v665_v13, %v664_v15 }
 0x177   : > { %v656_v31 = vmax.f32 %v594_v36, 0.0 }
 0x178   : > { %v669_v2 = vmax.f32 %v645_v62, 0.0  ;;  %v695_v3 = vpack.c.bf16 %v671_v61, %v670_v60  ;;  %v422_v28 = vpop.permute.xlu1 %421 }
 0x179   : > { %v597_v32 = vadd.f32 %v1925_v33, %v422_v28  ;;  %v1603_v33 = vld [vmem:[%s2017_s3 + $0x10] sm:$0xff]  }
 0x17a   : > { %v694_v7 = vpack.c.bf16 %v669_v2, %v668_v1  ;;  %1518 = vmatprep.subr.bf16.mxu1 %v695_v3 }
 0x17b   : > { %1519 = vmatpush3.bf16.msra.mxu1 %v695_v3  ;;  %v657_v38 = vmax.f32 %v597_v32, 0.0  ;;  %v785_v3 = vpop.permute.xlu0 %784 }
 0x17c   : > { %1520 = vmatprep.subr.bf16.mxu1 %v694_v7  ;;  %v790_v45 = vpop.permute.xlu1 %789 }
 0x17d   : > { %v688_v39 = vpack.c.bf16 %v657_v38, %v656_v31 }
 0x17f   : > { %1521 = vmatpush3.bf16.msra.mxu1 %v694_v7 }
 0x180   : > { %1522 = vmatprep.subr.bf16.mxu1 %v693_v12  ;;  %v775_v46 = vpop.permute.xlu1 %774 }
 0x183   : > { %1523 = vmatpush3.bf16.msra.mxu1 %v693_v12 }
 0x184   : > { %1524 = vmatprep.subr.bf16.mxu1 %v692_v18  ;;  %v780_v47 = vpop.permute.xlu1 %779 }
 0x187   : > { %1525 = vmatpush3.bf16.msra.mxu1 %v692_v18 }
 0x188   : > { %1526 = vmatprep.subr.bf16.mxu1 %v691_v23  ;;  %v765_v48 = vpop.permute.xlu1 %764 }
 0x18b   : > { %1527 = vmatpush3.bf16.msra.mxu1 %v691_v23 }
 0x18c   : > { %1528 = vmatprep.subr.bf16.mxu1 %v690_v34  ;;  %v770_v50 = vpop.permute.xlu1 %769 }
 0x18f   : > { %1529 = vmatpush3.bf16.msra.mxu1 %v690_v34 }
 0x190   : > { %1530 = vmatprep.subr.bf16.mxu1 %v689_v37  ;;  %v755_v54 = vpop.permute.xlu1 %754 }
 0x193   : > { %1531 = vmatpush3.bf16.msra.mxu1 %v689_v37 }
 0x194   : > { %1532 = vmatprep.subr.bf16.mxu1 %v688_v39  ;;  %v760_v58 = vpop.permute.xlu1 %759 }
 0x197   : > { %1533 = vmatpush3.bf16.msra.mxu1 %v688_v39  ;;  %v725_v39 = vpop.permute.xlu0 %724 }
 0x198   : > { %v745_v62 = vpop.permute.xlu1 %744 }
 0x19a   : > { %1535 = vmatmul.mubr.bf16.vlgmr.msra.gmra.mxu1 %v1602_v27 }
 0x19b   : > { %1538 = vmatprep.mubr.bf16.mxu1 %v1603_v33 }
 0x19c   : > { %v750_v2 = vpop.permute.xlu1 %749 }
 0x1a0   : > { %v735_v14 = vpop.permute.xlu1 %734 }
 0x1a2   : > { %1539 = vmatmul.mubr.bf16.gmra.mxu1 %v1604_v30 }
 0x1a3   : > { %1542 = vmatprep.mubr.bf16.mxu1 %v1605_v40 }
 0x1a4   : > { %v740_v24 = vpop.permute.xlu1 %739 }
 0x1a8   : > { %v730_v37 = vpop.permute.xlu1 %729 }
 0x1aa   : > { %1543 = vmatmul.mubr.bf16.gmra.mxu1 %v1606_v41 }
 0x1ab   : > { %1546 = vmatprep.mubr.bf16.mxu1 %v1607_v42 }
 0x1ac   : > { %v720_v42 = vpop.permute.xlu1 %719 }
 0x1b2   : > { %1547 = vmatmul.mubr.bf16.gmra.mxu1 %v1608_v43 }
 0x25a   : > { %v1976_v49 = vpop.f32.mrf.mxu1 }
 0x25b   : > { %v883_v40 = vadd.f32 %v1976_v49, %v725_v39  ;;  %v1610_v49 = vld [vmem:[%s2019_s5 + $0x8] sm:$0xff]  }
 0x25c   : > { %v1978_v51 = vpop.f32.mrf.mxu1 }
 0x25e   : > { %v1537_v52 = vpop.f32.mrf.mxu1 }
 0x25f   : > { %v886_v27 = vadd.f32 %v1537_v52, %v730_v37 }
 0x260   : > { %v1980_v53 = vpop.f32.mrf.mxu1 }
 0x261   : > { %v940_v43 = vmax.f32 %v886_v27, 0.0  ;;  %v878_v44 = vadd.f32 %v1980_v53, %v720_v42  ;;  %v1611_v53 = vld [vmem:[%s2019_s5 + $0x10] sm:$0xff]  }
 0x262   : > { %v1540_v55 = vpop.f32.mrf.mxu1 }
 0x263   : > { %v899_v29 = vadd.f32 %v1540_v55, %v745_v62  ;;  %v938_v52 = vmax.f32 %v878_v44, 0.0 }
 0x264   : > { %v890_v56 = vpop.f32.mrf.mxu1 }
 0x265   : > { %v943_v38 = vmax.f32 %v899_v29, 0.0  ;;  %v891_v31 = vadd.f32 %v890_v56, %v735_v14  ;;  %v1613_v56 = vld [vmem:[%s2019_s5 + $0x20] sm:$0xff]  }
 0x266   : > { %v1541_v57 = vpop.f32.mrf.mxu1 }
 0x267   : > { %v902_v25 = vadd.f32 %v1541_v57, %v750_v2  ;;  %v941_v41 = vmax.f32 %v891_v31, 0.0  ;;  %v1614_v57 = vld [vmem:[%s2019_s5 + $0x28] sm:$0xff]  }
 0x268   : > { %v893_v59 = vpop.f32.mrf.mxu1 }
 0x269   : > { %v944_v34 = vmax.f32 %v902_v25, 0.0  ;;  %v894_v35 = vadd.f32 %v893_v59, %v740_v24  ;;  %v1616_v59 = vld [vmem:[%s2019_s5 + $0x38] sm:$0xff]  }
 0x26a   : > { %v1544_v60 = vpop.f32.mrf.mxu1 }
 0x26b   : > { %v915_v15 = vadd.f32 %v1544_v60, %v765_v48  ;;  %v972_v33 = vpack.c.bf16 %v944_v34, %v943_v38  ;;  %v942_v30 = vmax.f32 %v894_v35, 0.0 }
 0x26c   : > { %v906_v61 = vpop.f32.mrf.mxu1 }
 0x26d   : > { %v947_v22 = vmax.f32 %v915_v15, 0.0  ;;  %v907_v23 = vadd.f32 %v906_v61, %v755_v54  ;;  %v1001_v61 = vpop.permute.xlu1 %1000 }
 0x26e   : > { %v1545_v63 = vpop.f32.mrf.mxu1 }
 0x26f   : > { %v918_v10 = vadd.f32 %v1545_v63, %v770_v50  ;;  %v945_v32 = vmax.f32 %v907_v23, 0.0 }
 0x270   : > { %v909_v0 = vpop.f32.mrf.mxu1 }
 0x271   : > { %v948_v19 = vmax.f32 %v918_v10, 0.0  ;;  %v910_v20 = vadd.f32 %v909_v0, %v760_v58  ;;  %v1615_v58 = vld [vmem:[%s2019_s5 + $0x30] sm:$0xff]   ;;  %v1011_v63 = vpop.permute.xlu1 %1010 }
 0x272   : > { %v1548_v1 = vpop.f32.mrf.mxu1 }
 0x273   : > { %v931_v5 = vadd.f32 %v1548_v1, %v785_v3  ;;  %v974_v26 = vpack.c.bf16 %v948_v19, %v947_v22  ;;  %v946_v28 = vmax.f32 %v910_v20, 0.0 }
 0x274   : > { %v922_v4 = vpop.f32.mrf.mxu1 }
 0x275   : > { %v923_v7 = vadd.f32 %v922_v4, %v775_v46  ;;  %v951_v11 = vmax.f32 %v931_v5, 0.0  ;;  %v973_v36 = vpack.c.bf16 %v946_v28, %v945_v32  ;;  %v715_v46 = vpop.permute.xlu0 %714  ;;  %v1253_v1 = vpop.permute.xlu1 %1252 }
 0x276   : > { %v1549_v6 = vpop.f32.mrf.mxu1  ;;  %v875_v48 = vadd.f32 %v1978_v51, %v715_v46  ;;  %v1612_v51 = vld [vmem:[%s2019_s5 + $0x18] sm:$0xff]  }
 0x277   : > { %v934_v8 = vadd.f32 %v1549_v6, %v790_v45  ;;  %v949_v16 = vmax.f32 %v923_v7, 0.0  ;;  %v971_v45 = vpack.c.bf16 %v942_v30, %v941_v41 }
 0x278   : > { %v925_v9 = vpop.f32.mrf.mxu1  ;;  %v937_v54 = vmax.f32 %v875_v48, 0.0 }
 0x279   : > { %v952_v12 = vmax.f32 %v934_v8, 0.0  ;;  %v926_v13 = vadd.f32 %v925_v9, %v780_v47  ;;  %v939_v47 = vmax.f32 %v883_v40, 0.0  ;;  %v996_v60 = vpop.permute.xlu0 %995  ;;  %v1263_v3 = vpop.permute.xlu1 %1262 }
 0x27a   : > { %v969_v55 = vpack.c.bf16 %v938_v52, %v937_v54 }
 0x27b   : > { %v976_v17 = vpack.c.bf16 %v952_v12, %v951_v11  ;;  %v950_v18 = vmax.f32 %v926_v13, 0.0  ;;  %v970_v50 = vpack.c.bf16 %v940_v43, %v939_v47 }
 0x27d   : > { %v975_v21 = vpack.c.bf16 %v950_v18, %v949_v16  ;;  %1550 = vmatprep.subr.bf16.mxu0 %v976_v17  ;;  %v1006_v62 = vpop.permute.xlu0 %1005  ;;  %v1268_v5 = vpop.permute.xlu1 %1267 }
 0x27e   : > { %1551 = vmatpush3.bf16.msra.mxu0 %v976_v17 }
 0x27f   : > { %1552 = vmatprep.subr.bf16.mxu0 %v975_v21 }
 0x281   : > { %v1016_v0 = vpop.permute.xlu0 %1015  ;;  %v1273_v7 = vpop.permute.xlu1 %1272 }
 0x282   : > { %1553 = vmatpush3.bf16.msra.mxu0 %v975_v21 }
 0x283   : > { %1554 = vmatprep.subr.bf16.mxu0 %v974_v26 }
 0x285   : > { %v1258_v2 = vpop.permute.xlu0 %1257  ;;  %v1278_v9 = vpop.permute.xlu1 %1277 }
 0x286   : > { %1555 = vmatpush3.bf16.msra.mxu0 %v974_v26 }
 0x287   : > { %1556 = vmatprep.subr.bf16.mxu0 %v973_v36 }
 0x289   : > { %v1021_v4 = vpop.permute.xlu0 %1020  ;;  %v1283_v11 = vpop.permute.xlu1 %1282 }
 0x28a   : > { %1557 = vmatpush3.bf16.msra.mxu0 %v973_v36 }
 0x28b   : > { %1558 = vmatprep.subr.bf16.mxu0 %v972_v33 }
 0x28d   : > { %v1026_v6 = vpop.permute.xlu0 %1025  ;;  %v1288_v13 = vpop.permute.xlu1 %1287 }
 0x28e   : > { %1559 = vmatpush3.bf16.msra.mxu0 %v972_v33 }
 0x28f   : > { %1560 = vmatprep.subr.bf16.mxu0 %v971_v45 }
 0x291   : > { %v1031_v8 = vpop.permute.xlu0 %1030  ;;  %v1293_v16 = vpop.permute.xlu1 %1292 }
 0x292   : > { %1561 = vmatpush3.bf16.msra.mxu0 %v971_v45 }
 0x293   : > { %1562 = vmatprep.subr.bf16.mxu0 %v970_v50 }
 0x295   : > { %v1036_v10 = vpop.permute.xlu0 %1035  ;;  %v1298_v26 = vpop.permute.xlu1 %1297 }
 0x296   : > { %1563 = vmatpush3.bf16.msra.mxu0 %v970_v50 }
 0x297   : > { %1564 = vmatprep.subr.bf16.mxu0 %v969_v55 }
 0x299   : > { %v1041_v12 = vpop.permute.xlu0 %1040  ;;  %v1303_v41 = vpop.permute.xlu1 %1302 }
 0x29a   : > { %1565 = vmatpush3.bf16.msra.mxu0 %v969_v55 }
 0x29d   : > { %1567 = vmatmul.mubr.bf16.vlgmr.msra.gmra.mxu0 %v1610_v49  ;;  %v1046_v14 = vpop.permute.xlu0 %1045 }
 0x29e   : > { %1570 = vmatprep.mubr.bf16.mxu0 %v1611_v53 }
 0x2a1   : > { %v1051_v21 = vpop.permute.xlu0 %1050 }
 0x2a5   : > { %1571 = vmatmul.mubr.bf16.gmra.mxu0 %v1612_v51  ;;  %v1056_v31 = vpop.permute.xlu0 %1055 }
 0x2a6   : > { %1574 = vmatprep.mubr.bf16.mxu0 %v1613_v56 }
 0x2a9   : > { %v1061_v55 = vpop.permute.xlu0 %1060 }
 0x2ad   : > { %1575 = vmatmul.mubr.bf16.gmra.mxu0 %v1614_v57 }
 0x2ae   : > { %1578 = vmatprep.mubr.bf16.mxu0 %v1615_v58  ;;  %v1308_v58 = vpop.permute.xlu1 %1307 }
 0x2b5   : > { %1579 = vmatmul.mubr.bf16.gmra.mxu0 %v1616_v59 }
 0x35d   : > { %v1568_v15 = vpop.f32.mrf.mxu0 }
 0x35e   : > { %v1164_v20 = vadd.f32 %v1568_v15, %v1006_v62 }
 0x35f   : > { %v1155_v17 = vpop.f32.mrf.mxu0 }
 0x360   : > { %v1156_v18 = vadd.f32 %v1155_v17, %v996_v60  ;;  %v1220_v29 = vmax.f32 %v1164_v20, 0.0 }
 0x361   : > { %v1569_v19 = vpop.f32.mrf.mxu0 }
 0x362   : > { %v1218_v23 = vmax.f32 %v1156_v18, 0.0  ;;  %v1167_v24 = vadd.f32 %v1569_v19, %v1011_v63  ;;  %v1332_v27 = vmul.f32 %v1263_v3, %v1220_v29  ;;  %v1313_v18 = vpop.permute.xlu1 %1312 }
 0x363   : > { %v1158_v22 = vpop.f32.mrf.mxu0 }
 0x364   : > { %v1159_v25 = vadd.f32 %v1158_v22, %v1001_v61  ;;  %v1330_v35 = vmul.f32 %v1253_v1, %v1218_v23  ;;  %v1221_v36 = vmax.f32 %v1167_v24, 0.0 }
 0x365   : > { %v1572_v28 = vpop.f32.mrf.mxu0 }
 0x366   : > { %v1219_v32 = vmax.f32 %v1159_v25, 0.0  ;;  %v1180_v30 = vadd.f32 %v1572_v28, %v1026_v6  ;;  %v1333_v43 = vmul.f32 %v1268_v5, %v1221_v36  ;;  %v1066_v5 = vpop.permute.xlu0 %1065 }
 0x367   : > { %v1171_v34 = vpop.f32.mrf.mxu0 }
 0x368   : > { %v1331_v37 = vmul.f32 %v1258_v2, %v1219_v32  ;;  %v1172_v38 = vadd.f32 %v1171_v34, %v1016_v0  ;;  %v1224_v48 = vmax.f32 %v1180_v30, 0.0 }
 0x369   : > { %v1573_v39 = vpop.f32.mrf.mxu0 }
 0x36a   : > { %v1346_v33 = vadd.f32 %v1331_v37, %v1330_v35  ;;  %v1222_v40 = vmax.f32 %v1172_v38, 0.0  ;;  %v1183_v45 = vadd.f32 %v1573_v39, %v1031_v8  ;;  %v1336_v60 = vmul.f32 %v1283_v11, %v1224_v48  ;;  %v1071_v25 = vpop.permute.xlu0 %1070 }
 0x36b   : > { %v1174_v42 = vpop.f32.mrf.mxu0  ;;  %v1368_v48 = vstv %s1367_s8 }
 0x36c   : > { %v1347_v44 = vadd.f32 %v1346_v33, %v1332_v27  ;;  %v1175_v46 = vadd.f32 %v1174_v42, %v1021_v4  ;;  %v1334_v50 = vmul.f32 %v1273_v7, %v1222_v40  ;;  %v1225_v51 = vmax.f32 %v1183_v45, 0.0 }
 0x36d   : > { %v1576_v47 = vpop.f32.mrf.mxu0 }
 0x36e   : > { %v1348_v52 = vadd.f32 %v1347_v44, %v1333_v43  ;;  %v1223_v54 = vmax.f32 %v1175_v46, 0.0  ;;  %v1196_v62 = vadd.f32 %v1576_v47, %v1046_v14  ;;  %v1337_v1 = vmul.f32 %v1288_v13, %v1225_v51  ;;  %v1323_v39 = vpop.permute.xlu0 %1322 }
 0x36f   : > { %v1187_v49 = vpop.f32.mrf.mxu0 }
 0x370   : > { %v1349_v53 = vadd.f32 %v1348_v52, %v1334_v50  ;;  %v1335_v56 = vmul.f32 %v1278_v9, %v1223_v54  ;;  %v1188_v57 = vadd.f32 %v1187_v49, %v1036_v10  ;;  %v1228_v7 = vmax.f32 %v1196_v62, 0.0 }
 0x371   : > { %v1577_v59 = vpop.f32.mrf.mxu0 }
 0x372   : > { %v1350_v61 = vadd.f32 %v1349_v53, %v1335_v56  ;;  %v1226_v63 = vmax.f32 %v1188_v57, 0.0  ;;  %v1199_v3 = vadd.f32 %v1577_v59, %v1051_v21  ;;  %v1340_v14 = vmul.f32 %v1303_v41, %v1228_v7 }
 0x373   : > { %v1190_v0 = vpop.f32.mrf.mxu0 }
 0x374   : > { %v1351_v2 = vadd.f32 %v1350_v61, %v1336_v60  ;;  %v1191_v4 = vadd.f32 %v1190_v0, %v1041_v12  ;;  %v1338_v8 = vmul.f32 %v1293_v16, %v1226_v63  ;;  %v1229_v19 = vmax.f32 %v1199_v3, 0.0  ;;  %v1318_v16 = vpop.permute.xlu1 %1317 }
 0x375   : > { %v1580_v6 = vpop.f32.mrf.mxu0 }
 0x376   : > { %v1352_v15 = vadd.f32 %v1351_v2, %v1337_v1  ;;  %v1227_v17 = vmax.f32 %v1191_v4, 0.0  ;;  %v1212_v24 = vadd.f32 %v1580_v6, %v1066_v5  ;;  %v1341_v12 = vmul.f32 %v1308_v58, %v1229_v19 }
 0x377   : > { %v1203_v9 = vpop.f32.mrf.mxu0 }
 0x378   : > { %v1353_v10 = vadd.f32 %v1352_v15, %v1338_v8  ;;  %v1339_v20 = vmul.f32 %v1298_v26, %v1227_v17  ;;  %v1204_v11 = vadd.f32 %v1203_v9, %v1056_v31  ;;  %v1232_v34 = vmax.f32 %v1212_v24, 0.0  ;;  %v1328_v30 = vpop.permute.xlu1 %1327 }
 0x379   : > { %v1581_v22 = vpop.f32.mrf.mxu0 }
 0x37a   : > { %v1354_v23 = vadd.f32 %v1353_v10, %v1339_v20  ;;  %v1230_v13 = vmax.f32 %v1204_v11, 0.0  ;;  %v1215_v29 = vadd.f32 %v1581_v22, %v1071_v25  ;;  %v1344_v27 = vmul.f32 %v1323_v39, %v1232_v34 }
 0x37b   : > { %v1206_v21 = vpop.f32.mrf.mxu0 }
 0x37c   : > { %v1355_v28 = vadd.f32 %v1354_v23, %v1340_v14  ;;  %v1207_v32 = vadd.f32 %v1206_v21, %v1061_v55  ;;  %v1342_v35 = vmul.f32 %v1313_v18, %v1230_v13  ;;  %v1233_v26 = vmax.f32 %v1215_v29, 0.0 }
 0x37e   : > { %v1356_v36 = vadd.f32 %v1355_v28, %v1341_v12  ;;  %v1231_v37 = vmax.f32 %v1207_v32, 0.0  ;;  %v1345_v40 = vmul.f32 %v1328_v30, %v1233_v26 }
 0x380   : > { %v1357_v38 = vadd.f32 %v1356_v36, %v1342_v35  ;;  %v1343_v31 = vmul.f32 %v1318_v16, %v1231_v37 }
 0x382   : > { %v1358_v33 = vadd.f32 %v1357_v38, %v1343_v31 }
 0x384   : > { %v1359_v41 = vadd.f32 %v1358_v33, %v1344_v27 }
 0x386   : > { %v1360_v42 = vadd.f32 %v1359_v41, %v1345_v40 }
 0x388   : > { %v1361_v43 = vrot.slane %v1360_v42, 4 }
 0x38a   : > { %v1362_v44 = vadd.f32 %v1361_v43, %v1360_v42 }
 0x38c   : > { %v1363_v45 = vrot.slane %v1362_v44, 2 }
 0x38e   : > { %v1364_v46 = vadd.f32 %v1363_v45, %v1362_v44 }
 0x390   : > { %v1365_v47 = vrot.slane %v1364_v46, 1 }
 0x392   : > { %v1366_v50 = vadd.f32 %v1365_v47, %v1364_v46 }
 0x394   : > { %v1369_v52 = vadd.f32 %v1368_v48, %v1366_v50 }
 0x396   : > { %1370 = vst [vmem:[%s331_s17] sm:$0x1] %v1369_v52 }
 0x397 PF: > { %s20_s11 = sadd.s32 1, %s1623_s11  }
 0x398   : > { %p17_p5 = scmp.ge.s32.totalorder %s20_s11, 4  }
 0x39a   :  { %19 = sbr.rel (!%p17_p5) target bundleno = 2 (0x2), region = 86 }

</bundles_post_ra>
